<compile_context>
chip_gen: v5e
topology: v5e:2x2
jax: 0.10.0
libtpu: 0.0.40
codegen_flags: <defaults>
</compile_context>

<pallas_src>
import functools

import jax
import jax.numpy as jnp
from jax.experimental import pallas as pl
from jax.experimental.pallas import tpu as pltpu


def _round_up(x, m):
    return (x + m - 1) // m * m


def _edge_mask_kernel(*refs, training, batched):
    # Tiled path   : x_ref (C, T)        out refs (ncls, T)
    # Batched path : x_ref (Nb, C, HW)   out refs (Nb, ncls, HW)
    if training:
        x_ref, we_ref, wm_ref, be_ref, bm_ref, mask_ref, edge_ref = refs
        we = we_ref[...]
        be = be_ref[...]
    else:
        x_ref, wm_ref, bm_ref, mask_ref = refs
    wm = wm_ref[...]
    bm = bm_ref[...]

    def emit(x, idx):
        # x: (C, T); two aligned dots written straight to their own refs.
        ym = jnp.dot(wm, x, preferred_element_type=jnp.float32) + bm
        if training:
            mask_ref[idx] = ym.astype(mask_ref.dtype)
            ye = jnp.dot(we, x, preferred_element_type=jnp.float32) + be
            edge_ref[idx] = ye.astype(edge_ref.dtype)
        else:
            mask_ref[idx] = jax.nn.sigmoid(ym).astype(mask_ref.dtype)

    if batched:
        for b in range(x_ref.shape[0]):   # Nb is small & static -> unrolled
            emit(x_ref[b], b)
    else:
        emit(x_ref[...], ...)


def mask_rcnn_edge_outputs_pallas(x_nchw, params, *, training=True,
                                  tile_hw=1024, nb_max=16,
                                  compute_dtype=jnp.float32):
    """Forward pass of mask_rcnn_edge_outputs.

    Args:
      x_nchw: (N, C, H, W) input.
      params: dict with
        'we' (ncls, Cin), 'be' (ncls,)          -- classify_edge
        'wm' (ncls, Cin+ncls), 'bm' (ncls,)     -- classify_mask, concat order [edge, x]
      training: True -> [mask, edge]; False -> sigmoid(mask).
      tile_hw: lane tile over H*W for the large-HW path (rounded to mult of 128).
      nb_max: max samples batched per grid step on the small-HW (ROI) path.
      compute_dtype: dtype for x / weights inside the kernel (bf16 halves the
        dominant HBM read; f32 default keeps exact numerics).
    """
    N, C, H, W = x_nchw.shape
    ncls = params['be'].shape[0]
    HW = H * W
    cd = jnp.dtype(compute_dtype)

    # --- one-time weight/bias fusion (tiny, O(Cin*ncls^2)) -------------------
    we = params['we'].astype(jnp.float32)          # (ncls, C)
    be = params['be'].astype(jnp.float32)          # (ncls,)
    wm = params['wm'].astype(jnp.float32)          # (ncls, C+ncls)
    bm = params['bm'].astype(jnp.float32)          # (ncls,)
    wm_e, wm_x = wm[:, :ncls], wm[:, ncls:]        # acts on edge / on x  ([edge, x] order)
    wm_f = wm_x + wm_e @ we                        # (ncls, C)
    bm_f = bm + wm_e @ be                          # (ncls,)

    we_k = we.astype(cd)
    wm_k = wm_f.astype(cd)
    be_col = be.reshape(ncls, 1)                   # biases stay f32 (added post-dot)
    bm_col = bm_f.reshape(ncls, 1)

    # --- NCHW -> (N, C, HW); free reshape, no pad, no post-slice -------------
    x = x_nchw.reshape(N, C, HW).astype(cd)

    tile = max(128, _round_up(tile_hw, 128))
    w_spec = pl.BlockSpec((ncls, C), lambda i: (0, 0))
    b_spec = pl.BlockSpec((ncls, 1), lambda i: (0, 0))

    if HW >= tile:
        # Large feature maps: tile the lane axis; flatten (N, HW-tiles) into one
        # parallel grid axis so both v7x TensorCores get work even when N == 1.
        ht = pl.cdiv(HW, tile)                     # last tile may be partial (masked vst)
        grid = (N * ht,)
        x_spec = pl.BlockSpec((None, C, tile), lambda i: (i // ht, 0, i % ht))
        o_spec = pl.BlockSpec((None, ncls, tile), lambda i: (i // ht, 0, i % ht))
        batched = False
    else:
        # ROI-style small HW with (potentially) many samples: batch Nb samples
        # per grid step to amortize per-step overhead.  Full-extent (C, HW)
        # block -> no (8,128) divisibility requirement, no padding.
        per_sample = C * HW * 4
        nb = max(1, min(nb_max, N, (2 * 1024 * 1024) // max(per_sample, 1)))
        grid = (pl.cdiv(N, nb),)
        x_spec = pl.BlockSpec((nb, C, HW), lambda i: (i, 0, 0))
        o_spec = pl.BlockSpec((nb, ncls, HW), lambda i: (i, 0, 0))
        batched = True

    kernel = functools.partial(_edge_mask_kernel, training=training, batched=batched)
    out_sds = jax.ShapeDtypeStruct((N, ncls, HW), jnp.float32)

    if training:
        ins = (x, we_k, wm_k, be_col, bm_col)
        in_specs = [x_spec, w_spec, w_spec, b_spec, b_spec]
        out_shapes = (out_sds, out_sds)            # (mask, edge)
        out_specs = (o_spec, o_spec)
    else:
        ins = (x, wm_k, bm_col)                    # edge never computed in eval
        in_specs = [x_spec, w_spec, b_spec]
        out_shapes = (out_sds,)
        out_specs = (o_spec,)

    outs = pl.pallas_call(
        kernel,
        out_shape=out_shapes,
        grid_spec=pl.GridSpec(grid=grid, in_specs=in_specs, out_specs=out_specs),
        compiler_params=pltpu.CompilerParams(dimension_semantics=("parallel",)),
    )(*ins)

    def to_nchw(y):
        return y.reshape(N, ncls, H, W)

    if training:
        mask, edge = outs
        return [to_nchw(mask), to_nchw(edge)]
    return to_nchw(outs[0])


def init_params(key, dim_in, n_classes, std=0.001):
    """Deterministic init mirroring init.normal_(std=0.001) + zero bias."""
    k1, k2 = jax.random.split(key)
    we = std * jax.random.normal(k1, (n_classes, dim_in), jnp.float32)
    wm = std * jax.random.normal(k2, (n_classes, dim_in + n_classes), jnp.float32)
    be = jnp.zeros((n_classes,), jnp.float32)
    bm = jnp.zeros((n_classes,), jnp.float32)
    # TODO(synk): MSRAFill init branch (cfg-dependent) not reproduced; normal std=0.001 used.
    return {'we': we, 'be': be, 'wm': wm, 'bm': bm}


def _reference(x, params):
    we, be, wm, bm = params['we'], params['be'], params['wm'], params['bm']
    edge = jnp.einsum('nchw,kc->nkhw', x, we) + be[None, :, None, None]
    cat = jnp.concatenate([edge, x], axis=1)
    mask = jnp.einsum('nchw,kc->nkhw', cat, wm) + bm[None, :, None, None]
    return mask, edge


if __name__ == "__main__":
    key = jax.random.PRNGKey(0)
    kx, kp, kx2, kx3 = jax.random.split(key, 4)

    N, dim_in, H, W = 2, 16, 16, 16
    n_classes = 8

    x = jax.random.normal(kx, (N, dim_in, H, W), jnp.float32)
    params = init_params(kp, dim_in, n_classes)

    # training mode (small-HW batched path): [mask, edge]
    mask_t, edge_t = mask_rcnn_edge_outputs_pallas(x, params, training=True)
    # eval mode: sigmoid(mask) only (fused weight, no edge compute)
    probs = mask_rcnn_edge_outputs_pallas(x, params, training=False)
    jax.block_until_ready((mask_t, edge_t, probs))

    mask_ref, edge_ref = _reference(x, params)
    assert jnp.allclose(edge_t, edge_ref, atol=1e-5)
    assert jnp.allclose(mask_t, mask_ref, atol=1e-5)
    assert jnp.allclose(probs, jax.nn.sigmoid(mask_ref), atol=1e-5)

    # ROI-style 14x14 (HW=196, not a multiple of 128) -> full-extent HW block.
    x2 = jax.random.normal(kx2, (N, dim_in, 14, 14), jnp.float32)
    mask2, edge2 = mask_rcnn_edge_outputs_pallas(x2, params, training=True)
    jax.block_until_ready((mask2, edge2))
    mask2_ref, edge2_ref = _reference(x2, params)
    assert jnp.allclose(edge2, edge2_ref, atol=1e-5)
    assert jnp.allclose(mask2, mask2_ref, atol=1e-5)

    # Large-HW tiled path with a partial (masked) last lane tile: 40x40 -> HW=1600.
    x3 = jax.random.normal(kx3, (1, dim_in, 40, 40), jnp.float32)
    mask3, edge3 = mask_rcnn_edge_outputs_pallas(x3, params, training=True)
    probs3 = mask_rcnn_edge_outputs_pallas(x3, params, training=False)
    jax.block_until_ready((mask3, edge3, probs3))
    mask3_ref, edge3_ref = _reference(x3, params)
    assert jnp.allclose(edge3, edge3_ref, atol=1e-5)
    assert jnp.allclose(mask3, mask3_ref, atol=1e-5)
    assert jnp.allclose(probs3, jax.nn.sigmoid(mask3_ref), atol=1e-5)

    print("KERNEL_OK")
</pallas_src>

<mosaic_0001>
module attributes {stable_mosaic.version = 11 : i64} {
  func.func @_edge_mask_kernel(%arg0: i32, %arg1: memref<2x16x256xf32, #tpu.memory_space<vmem>>, %arg2: memref<8x16xf32, #tpu.memory_space<vmem>>, %arg3: memref<8x16xf32, #tpu.memory_space<vmem>>, %arg4: memref<8x1xf32, #tpu.memory_space<vmem>>, %arg5: memref<8x1xf32, #tpu.memory_space<vmem>>, %arg6: memref<2x8x256xf32, #tpu.memory_space<vmem>>, %arg7: memref<2x8x256xf32, #tpu.memory_space<vmem>>) attributes {dimension_semantics = [#tpu.dimension_semantics<parallel>], iteration_bounds = array<i64: 1>, scalar_prefetch = 0 : i64, scratch_operands = 0 : i64, tpu.core_type = #tpu.core_type<tc>, window_params = [{transform_indices = @transform_0, window_bounds = array<i64: 2, 16, 256>}, {pipeline_mode = #tpu.pipeline_mode<synchronous>, transform_indices = @transform_1, window_bounds = array<i64: 8, 16>}, {pipeline_mode = #tpu.pipeline_mode<synchronous>, transform_indices = @transform_2, window_bounds = array<i64: 8, 16>}, {pipeline_mode = #tpu.pipeline_mode<synchronous>, transform_indices = @transform_3, window_bounds = array<i64: 8, 1>}, {pipeline_mode = #tpu.pipeline_mode<synchronous>, transform_indices = @transform_4, window_bounds = array<i64: 8, 1>}, {transform_indices = @transform_5, window_bounds = array<i64: 2, 8, 256>}, {transform_indices = @transform_6, window_bounds = array<i64: 2, 8, 256>}]} {
    %c0 = arith.constant 0 : index
    %c0_0 = arith.constant 0 : index
    %0 = vector.load %arg2[%c0, %c0_0] : memref<8x16xf32, #tpu.memory_space<vmem>>, vector<8x16xf32>
    %c0_1 = arith.constant 0 : index
    %c0_2 = arith.constant 0 : index
    %1 = vector.load %arg4[%c0_1, %c0_2] : memref<8x1xf32, #tpu.memory_space<vmem>>, vector<8x1xf32>
    %c0_3 = arith.constant 0 : index
    %c0_4 = arith.constant 0 : index
    %2 = vector.load %arg3[%c0_3, %c0_4] : memref<8x16xf32, #tpu.memory_space<vmem>>, vector<8x16xf32>
    %c0_5 = arith.constant 0 : index
    %c0_6 = arith.constant 0 : index
    %3 = vector.load %arg5[%c0_5, %c0_6] : memref<8x1xf32, #tpu.memory_space<vmem>>, vector<8x1xf32>
    %c0_7 = arith.constant 0 : index
    %c0_8 = arith.constant 0 : index
    %c0_9 = arith.constant 0 : index
    %4 = vector.load %arg1[%c0_7, %c0_8, %c0_9] : memref<2x16x256xf32, #tpu.memory_space<vmem>>, vector<1x16x256xf32>
    %5 = vector.shape_cast %4 : vector<1x16x256xf32> to vector<16x256xf32>
    %cst = arith.constant dense<0.000000e+00> : vector<8x256xf32>
    %6 = tpu.matmul %2, %5, %cst {dimension_numbers = #tpu.dot_dimension_numbers<[1], [0], [0], [1], [0, 0, 1, 1], [], []>} : vector<8x16xf32>, vector<16x256xf32>, vector<8x256xf32> -> vector<8x256xf32>
    %7 = vector.broadcast %3 : vector<8x1xf32> to vector<8x256xf32>
    %8 = arith.addf %6, %7 : vector<8x256xf32>
    %c0_10 = arith.constant 0 : index
    %c0_11 = arith.constant 0 : index
    %c0_12 = arith.constant 0 : index
    %9 = vector.load %arg6[%c0_10, %c0_11, %c0_12] : memref<2x8x256xf32, #tpu.memory_space<vmem>>, vector<1x8x256xf32>
    %10 = vector.shape_cast %9 : vector<1x8x256xf32> to vector<8x256xf32>
    %11 = vector.shape_cast %8 : vector<8x256xf32> to vector<1x8x256xf32>
    tpu.vector_store %arg6[%c0_10, %c0_11, %c0_12], %11 {strides = array<i32>} : memref<2x8x256xf32, #tpu.memory_space<vmem>>, vector<1x8x256xf32>,
    %cst_13 = arith.constant dense<0.000000e+00> : vector<8x256xf32>
    %12 = tpu.matmul %0, %5, %cst_13 {dimension_numbers = #tpu.dot_dimension_numbers<[1], [0], [0], [1], [0, 0, 1, 1], [], []>} : vector<8x16xf32>, vector<16x256xf32>, vector<8x256xf32> -> vector<8x256xf32>
    %13 = vector.broadcast %1 : vector<8x1xf32> to vector<8x256xf32>
    %14 = arith.addf %12, %13 : vector<8x256xf32>
    %c0_14 = arith.constant 0 : index
    %c0_15 = arith.constant 0 : index
    %c0_16 = arith.constant 0 : index
    %15 = vector.load %arg7[%c0_14, %c0_15, %c0_16] : memref<2x8x256xf32, #tpu.memory_space<vmem>>, vector<1x8x256xf32>
    %16 = vector.shape_cast %15 : vector<1x8x256xf32> to vector<8x256xf32>
    %17 = vector.shape_cast %14 : vector<8x256xf32> to vector<1x8x256xf32>
    tpu.vector_store %arg7[%c0_14, %c0_15, %c0_16], %17 {strides = array<i32>} : memref<2x8x256xf32, #tpu.memory_space<vmem>>, vector<1x8x256xf32>,
    %c1 = arith.constant 1 : index
    %c0_17 = arith.constant 0 : index
    %c0_18 = arith.constant 0 : index
    %18 = vector.load %arg1[%c1, %c0_17, %c0_18] : memref<2x16x256xf32, #tpu.memory_space<vmem>>, vector<1x16x256xf32>
    %19 = vector.shape_cast %18 : vector<1x16x256xf32> to vector<16x256xf32>
    %cst_19 = arith.constant dense<0.000000e+00> : vector<8x256xf32>
    %20 = tpu.matmul %2, %19, %cst_19 {dimension_numbers = #tpu.dot_dimension_numbers<[1], [0], [0], [1], [0, 0, 1, 1], [], []>} : vector<8x16xf32>, vector<16x256xf32>, vector<8x256xf32> -> vector<8x256xf32>
    %21 = vector.broadcast %3 : vector<8x1xf32> to vector<8x256xf32>
    %22 = arith.addf %20, %21 : vector<8x256xf32>
    %c1_20 = arith.constant 1 : index
    %c0_21 = arith.constant 0 : index
    %c0_22 = arith.constant 0 : index
    %23 = vector.load %arg6[%c1_20, %c0_21, %c0_22] : memref<2x8x256xf32, #tpu.memory_space<vmem>>, vector<1x8x256xf32>
    %24 = vector.shape_cast %23 : vector<1x8x256xf32> to vector<8x256xf32>
    %25 = vector.shape_cast %22 : vector<8x256xf32> to vector<1x8x256xf32>
    tpu.vector_store %arg6[%c1_20, %c0_21, %c0_22], %25 {strides = array<i32>} : memref<2x8x256xf32, #tpu.memory_space<vmem>>, vector<1x8x256xf32>,
    %cst_23 = arith.constant dense<0.000000e+00> : vector<8x256xf32>
    %26 = tpu.matmul %0, %19, %cst_23 {dimension_numbers = #tpu.dot_dimension_numbers<[1], [0], [0], [1], [0, 0, 1, 1], [], []>} : vector<8x16xf32>, vector<16x256xf32>, vector<8x256xf32> -> vector<8x256xf32>
    %27 = vector.broadcast %1 : vector<8x1xf32> to vector<8x256xf32>
    %28 = arith.addf %26, %27 : vector<8x256xf32>
    %c1_24 = arith.constant 1 : index
    %c0_25 = arith.constant 0 : index
    %c0_26 = arith.constant 0 : index
    %29 = vector.load %arg7[%c1_24, %c0_25, %c0_26] : memref<2x8x256xf32, #tpu.memory_space<vmem>>, vector<1x8x256xf32>
    %30 = vector.shape_cast %29 : vector<1x8x256xf32> to vector<8x256xf32>
    %31 = vector.shape_cast %28 : vector<8x256xf32> to vector<1x8x256xf32>
    tpu.vector_store %arg7[%c1_24, %c0_25, %c0_26], %31 {strides = array<i32>} : memref<2x8x256xf32, #tpu.memory_space<vmem>>, vector<1x8x256xf32>,
    return
  }
  func.func @transform_0(%arg0: i32) -> (i32, i32, i32) {
    %c0_i32 = arith.constant 0 : i32
    %c0_i32_0 = arith.constant 0 : i32
    %c0_i32_1 = arith.constant 0 : i32
    return %arg0, %c0_i32, %c0_i32_0 : i32, i32, i32
  }
  func.func @transform_1(%arg0: i32) -> (i32, i32) {
    %c0_i32 = arith.constant 0 : i32
    %c0_i32_0 = arith.constant 0 : i32
    %c0_i32_1 = arith.constant 0 : i32
    return %c0_i32, %c0_i32_0 : i32, i32
  }
  func.func @transform_2(%arg0: i32) -> (i32, i32) {
    %c0_i32 = arith.constant 0 : i32
    %c0_i32_0 = arith.constant 0 : i32
    %c0_i32_1 = arith.constant 0 : i32
    return %c0_i32, %c0_i32_0 : i32, i32
  }
  func.func @transform_3(%arg0: i32) -> (i32, i32) {
    %c0_i32 = arith.constant 0 : i32
    %c0_i32_0 = arith.constant 0 : i32
    %c0_i32_1 = arith.constant 0 : i32
    return %c0_i32, %c0_i32_0 : i32, i32
  }
  func.func @transform_4(%arg0: i32) -> (i32, i32) {
    %c0_i32 = arith.constant 0 : i32
    %c0_i32_0 = arith.constant 0 : i32
    %c0_i32_1 = arith.constant 0 : i32
    return %c0_i32, %c0_i32_0 : i32, i32
  }
  func.func @transform_5(%arg0: i32) -> (i32, i32, i32) {
    %c0_i32 = arith.constant 0 : i32
    %c0_i32_0 = arith.constant 0 : i32
    %c0_i32_1 = arith.constant 0 : i32
    return %arg0, %c0_i32, %c0_i32_0 : i32, i32, i32
  }
  func.func @transform_6(%arg0: i32) -> (i32, i32, i32) {
    %c0_i32 = arith.constant 0 : i32
    %c0_i32_0 = arith.constant 0 : i32
    %c0_i32_1 = arith.constant 0 : i32
    return %arg0, %c0_i32, %c0_i32_0 : i32, i32, i32
  }
}

</mosaic_0001>

<bundles_post_ra>
// kernel: tpu_custom_call.1
= control target key start
LH: loop header
LB: loop body
LE: loop exit
PB: predicated region body
PF: predicated region fallthrough
CT: control target
= control target key end

     0   :  { %12 = vsyncpa [#allocation3], 0  ;;  %s449_s0 = inlined_call_operand.hbm [shape: f32[2,16,256], index: 0, kind: input, shape index: {}]   ;;  %s450_s1 = inlined_call_operand.vmem [shape: f32[8,16], index: 1, kind: input, shape index: {}]   ;;  %s451_s2 = inlined_call_operand.vmem [shape: f32[8,16], index: 2, kind: input, shape index: {}]   ;;  %s452_s3 = inlined_call_operand.vmem [shape: f32[8,1], index: 3, kind: input, shape index: {}]   ;;  %s453_s4 = inlined_call_operand.vmem [shape: f32[8,1], index: 4, kind: input, shape index: {}]   ;;  %s454_s5 = inlined_call_operand.hbm [shape: f32[2,8,256], index: 5, kind: output, shape index: {0}]   ;;  %s455_s6 = inlined_call_operand.hbm [shape: f32[2,8,256], index: 6, kind: output, shape index: {1}]  }
   0x1   :  { %13 = vsyncpa [#allocation4], 0 }
   0x2   :  { %14 = vsyncpa [#allocation7], 0  ;;  %s19_s23 = sshll.u32 %s449_s0, 4  ;;  %s370_s24 = smov [#allocation2]   ;;  %s20_s23 = int_to_ptr.hbm [resolvable:$true] %s19_s23 }
   0x3   :  { %s21_s25 = sshll.u32 %s370_s24, 4  ;;  %s371_s26 = smov 256   ;;  %s22_s25 = int_to_ptr.vmem [resolvable:$true] %s21_s25 }
   0x4   :  { %s372_s27 = smov 16  }
   0x5   :  { %27 = dma.hbm_to_vmem [thread:$0]  %s20_s23, 1024, %s22_s25, [#allocation3], %s371_s26, %s371_s26, %s372_s27  }
   0x6   :  { %364 = dma.done.wait [#allocation3], 1024  }
   0x7   :  { %365 = vsyncadd [#allocation3], 4294966272  ;;  %v373_v0 = vmov 0   ;;  %v46_v1 = vld [vmem:[#allocation2 + $0x10] sm:$0xff]  ;;  %v47_v2 = vld [vmem:[#allocation2 + $0x18] sm:$0xff]  ;;  %vm53_vm0 = vcmask 130048  }
   0x8   :  { %291 = vset.pattern.permute.xlu0 %v373_v0  ;;  %v44_v3 = vld [vmem:[#allocation2] sm:$0xff]  ;;  %71 = vmatpush.msra.mxu0 %v46_v1  ;;  %v45_v4 = vld [vmem:[#allocation2 + $0x8] sm:$0xff]  ;;  %v152_v7 = vld [vmem:[#allocation2 + $0x30] sm:$0xff]  ;;  %s375_s12 = smov [#allocation6]   ;;  %s259_s16 = sshll.u32 %s455_s6, 4  ;;  %s260_s16 = int_to_ptr.hbm [resolvable:$true] %s259_s16 }
   0x9   :  { %91 = vmatpush.msra.mxu1 %v47_v2  ;;  %121 = vmatpush.msra.mxu2 %v46_v1  ;;  %v42_v5 = vld [vmem:[%s451_s2] sm:$0xff]  ;;  %v153_v8 = vld [vmem:[#allocation2 + $0x38] sm:$0xff]  ;;  %v151_v10 = vld [vmem:[#allocation2 + $0x28] sm:$0xff]  ;;  %s257_s13 = sshll.u32 %s375_s12, 4  ;;  %s258_s13 = int_to_ptr.vmem [resolvable:$true] %s257_s13 }
   0xa   :  { %141 = vmatpush.msra.mxu3 %v47_v2  ;;  %72 = vmatpush.msra.mxu0 %v44_v3  ;;  %v40_v6 = vld [vmem:[%s450_s1] sm:$0xff] }
   0xb   :  { %92 = vmatpush.msra.mxu1 %v45_v4  ;;  %122 = vmatpush.msra.mxu2 %v44_v3  ;;  %v150_v9 = vld [vmem:[#allocation2 + $0x20] sm:$0xff] }
   0xc   :  { %142 = vmatpush.msra.mxu3 %v45_v4  ;;  %277 = vmatmul.msk.f32.vlgmr.msra.gmra.mxu0 %vm53_vm0, %v42_v5  ;;  %v43_v11 = vld [vmem:[%s453_s4] sm:$0xff]  ;;  %s374_s4 = smov [#allocation5]  }
   0xd   :  { %278 = vmatmul.msk.f32.vlgmr.msra.gmra.mxu1 %vm53_vm0, %v42_v5  ;;  %279 = vmatmul.msk.f32.vlgmr.msra.gmra.mxu2 %vm53_vm0, %v40_v6  ;;  %v41_v12 = vld [vmem:[%s452_s3] sm:$0xff]  ;;  %s244_s9 = sshll.u32 %s374_s4, 4  ;;  %s246_s3 = sshll.u32 %s454_s5, 4  ;;  %s245_s9 = int_to_ptr.vmem [resolvable:$true] %s244_s9  ;;  %s247_s3 = int_to_ptr.hbm [resolvable:$true] %s246_s3 }
   0xe   :  { %280 = vmatmul.msk.f32.vlgmr.msra.gmra.mxu3 %vm53_vm0, %v40_v6  ;;  %211 = vmatpush.msrb.mxu2 %v152_v7 }
   0xf   :  { %231 = vmatpush.msrb.mxu3 %v153_v8  ;;  %168 = vmatpush.msrb.mxu0 %v152_v7 }
  0x10   :  { %188 = vmatpush.msrb.mxu1 %v153_v8  ;;  %212 = vmatpush.msrb.mxu2 %v150_v9 }
  0x11   :  { %232 = vmatpush.msrb.mxu3 %v151_v10  ;;  %169 = vmatpush.msrb.mxu0 %v150_v9 }
  0x12   :  { %189 = vmatpush.msrb.mxu1 %v151_v10  ;;  %50 = vperm.xlu0 %291, %v43_v11  }
  0x14   :  { %281 = vmatmul.msk.f32.vlgmr.msrb.gmra.mxu0 %vm53_vm0, %v42_v5 }
  0x15   :  { %282 = vmatmul.msk.f32.vlgmr.msrb.gmra.mxu1 %vm53_vm0, %v42_v5  ;;  %283 = vmatmul.msk.f32.vlgmr.msrb.gmra.mxu2 %vm53_vm0, %v40_v6 }
  0x16   :  { %284 = vmatmul.msk.f32.vlgmr.msrb.gmra.mxu3 %vm53_vm0, %v40_v6 }
  0x1a   :  { %101 = vperm.xlu0 %291, %v41_v12  }
  0x84   :  { %v51_v13 = vpop.permute.xlu0 %50 }
  0x89   :  { %v74_v14 = vpop.f32.mrf.mxu0 }
  0x8a   :  { %v94_v15 = vpop.f32.mrf.mxu1  ;;  %v75_v16 = vadd.f32 %v74_v14, %v51_v13 }
  0x8b   :  { %v95_v17 = vadd.f32 %v94_v15, %v51_v13 }
  0x8c   :  { %97 = vst [vmem:[#allocation5] sm:$0xff] %v75_v16  ;;  %v102_v18 = vpop.permute.xlu0 %101 }
  0x8d   :  { %98 = vst [vmem:[#allocation5 + $0x8] sm:$0xff] %v95_v17 }
  0x90   :  { %v124_v19 = vpop.f32.mrf.mxu2 }
  0x91   :  { %v144_v20 = vpop.f32.mrf.mxu3  ;;  %v125_v21 = vadd.f32 %v124_v19, %v102_v18  ;;  %v171_v23 = vpop.f32.mrf.mxu0 }
  0x92   :  { %v145_v22 = vadd.f32 %v144_v20, %v102_v18  ;;  %v191_v24 = vpop.f32.mrf.mxu1  ;;  %v172_v25 = vadd.f32 %v171_v23, %v51_v13 }
  0x93   :  { %v192_v26 = vadd.f32 %v191_v24, %v51_v13  ;;  %147 = vst [vmem:[#allocation6] sm:$0xff] %v125_v21 }
  0x94   :  { %148 = vst [vmem:[#allocation6 + $0x8] sm:$0xff] %v145_v22 }
  0x95   :  { %195 = vst [vmem:[#allocation5 + $0x10] sm:$0xff] %v172_v25 }
  0x96   :  { %196 = vst [vmem:[#allocation5 + $0x18] sm:$0xff] %v192_v26 }
  0x97   :  { %252 = dma.vmem_to_hbm [thread:$0]  %s245_s9, 512, %s247_s3, [#allocation4], %s371_s26, %s371_s26, %s372_s27  }
  0x98   :  { %v214_v27 = vpop.f32.mrf.mxu2 }
  0x99   :  { %v234_v28 = vpop.f32.mrf.mxu3  ;;  %v215_v29 = vadd.f32 %v214_v27, %v102_v18 }
  0x9a   :  { %v235_v30 = vadd.f32 %v234_v28, %v102_v18 }
  0x9b   :  { %238 = vst [vmem:[#allocation6 + $0x10] sm:$0xff] %v215_v29 }
  0x9c   :  { %239 = vst [vmem:[#allocation6 + $0x18] sm:$0xff] %v235_v30 }
  0x9d   :  { %265 = dma.vmem_to_hbm [thread:$0]  %s258_s13, 512, %s260_s16, [#allocation7], %s371_s26, %s371_s26, %s372_s27  }
  0x9e   :  { %366 = dma.done.wait [#allocation4], 512  }
  0x9f   :  { %367 = vsyncadd [#allocation4], 4294966784 }
  0xa0   :  { %368 = dma.done.wait [#allocation7], 512  }
  0xa1   :  { %369 = vsyncadd [#allocation7], 4294966784 }
  0xa2   :  { %274 = vsyncpa [#allocation3], 1 }
  0xa3   :  { %275 = vsyncpa [#allocation4], 1 }
  0xa4   :  { %276 = vsyncpa [#allocation7], 1 }

</bundles_post_ra>
